<compile_context>
chip_gen: v6e
topology: v6e:2x2x1
jax: 0.10.0
libtpu: 0.0.40
codegen_flags: <defaults>
</compile_context>

<pallas_src>
import jax
import jax.numpy as jnp
from jax.experimental import pallas as pl
from jax.experimental.pallas import tpu as pltpu


def _copy_kernel(x_ref, o_ref):
    # Straight lane-dense tile copy: one unmasked load + one unmasked store.
    o_ref[...] = x_ref[...]


def _default_block_bytes():
    """Per-generation block-size default.

    v5e: small scoped VMEM -> ~2 MiB blocks (still ~85% of HBM roofline).
    v7x: ~3.2 TB/s HBM -> ~8 MiB blocks to amortize per-grid-step overhead.
    v6e / unknown: 4 MiB.
    """
    try:
        kind = jax.devices()[0].device_kind.lower()
    except Exception:
        return 4 << 20
    if "v5" in kind and ("lite" in kind or "v5e" in kind):
        return 2 << 20
    if "v7" in kind:
        return 8 << 20
    return 4 << 20


def flatten_layer(x, *, target_block_bytes=None, donate=False):
    """Pallas equivalent of FlattenLayer.forward: (N, ...) -> (N, prod(rest)).

    Semantics match torch's x.view(N, -1) on a contiguous tensor: element
    (n, c, h, w) of an NCHW input lands at output column c*H*W + h*W + w.
    """
    N = x.shape[0]
    F = 1
    for d in x.shape[1:]:
        F *= d
    total = N * F
    dtype_bytes = jnp.dtype(x.dtype).itemsize
    if target_block_bytes is None:
        target_block_bytes = _default_block_bytes()

    # Metadata-only flatten (the flatten itself is free; the kernel below is
    # just the mandated materializing copy, done at roofline).
    flat = jnp.reshape(x, (total,))

    # Lane-dense layout: widest divisor of `total` among {2048..128}; if none
    # exists, pad up to a multiple of 512 (negligible extra traffic) so every
    # shape keeps the pipelined, unmasked-vst tiled-copy path instead of
    # degenerating into one whole-array block.
    lane = None
    for cand in (2048, 1024, 512, 256, 128):
        if total % cand == 0:
            lane = cand
            break
    if lane is None:
        lane = 512
        total_p = pl.cdiv(total, lane) * lane
        flat = jnp.pad(flat, (0, total_p - total))
    else:
        total_p = total

    rows = total_p // lane
    xr = jnp.reshape(flat, (rows, lane))  # metadata-only re-view

    # Block sizing: ~target bytes per block, aligned to the dtype's packed
    # sublane tile (8 for 4-byte, 16 for 2-byte, 32 for 1-byte dtypes), and at
    # least two grid steps when possible so v7x megacore splits the copy.
    sub = max(8, 32 // max(1, dtype_bytes))
    row_bytes = lane * dtype_bytes
    blk_rows = max(1, target_block_bytes // row_bytes)
    if rows >= sub:
        blk_rows = max(sub, (blk_rows // sub) * sub)
    if blk_rows >= rows and rows >= 2 * sub:
        half = pl.cdiv(rows, 2)
        blk_rows = max(sub, (half // sub) * sub)
    blk_rows = min(blk_rows, rows)

    grid = (pl.cdiv(rows, blk_rows),)
    block_bytes = blk_rows * lane * dtype_bytes
    # Explicit VMEM budget: in+out double-buffered (4 buffers) + ~25% headroom,
    # independent of the per-chip scoped default (16/32/32 MiB).
    vmem_limit = int(min(max(8 << 20, 5 * block_bytes), 100 << 20))

    extra_kwargs = {}
    if donate:
        # Caller promises to donate x: reuse its HBM allocation for the output.
        extra_kwargs["input_output_aliases"] = {0: 0}

    out2d = pl.pallas_call(
        _copy_kernel,
        out_shape=jax.ShapeDtypeStruct((rows, lane), x.dtype),
        grid_spec=pltpu.PrefetchScalarGridSpec(
            num_scalar_prefetch=0,
            grid=grid,
            in_specs=[pl.BlockSpec((blk_rows, lane), lambda i: (i, 0))],
            out_specs=pl.BlockSpec((blk_rows, lane), lambda i: (i, 0)),
        ),
        compiler_params=pltpu.CompilerParams(
            # Every chunk is independent -> shard across both TCs on v7x.
            dimension_semantics=("parallel",),
            vmem_limit_bytes=vmem_limit,
        ),
        # Pure mem-bound copy: help XLA schedule/overlap the custom call.
        cost_estimate=pl.CostEstimate(
            flops=0,
            transcendentals=0,
            bytes_accessed=2 * rows * lane * dtype_bytes,
        ),
        **extra_kwargs,
    )(xr)

    out_flat = jnp.reshape(out2d, (total_p,))
    if total_p != total:
        out_flat = out_flat[:total]  # drop padding

    # Metadata-only reshape back to the module's (N, C*H*W) output layout.
    return jnp.reshape(out_flat, (N, F))


if __name__ == "__main__":
    key = jax.random.PRNGKey(0)
    N, C, H, W = 2, 4, 16, 16
    x = jax.random.normal(key, (N, C, H, W), dtype=jnp.float32)

    out = flatten_layer(x)
    out = jax.block_until_ready(out)

    ref = jnp.reshape(x, (N, -1))  # same semantics as torch .view(N, -1)
    assert out.shape == (N, C * H * W), out.shape
    assert out.dtype == x.dtype, out.dtype
    assert bool(jnp.array_equal(out, ref)), "mismatch vs. reference flatten"

    # Exercise the padded (non-divisible-by-128) fallback path as well.
    x2 = jax.random.normal(key, (3, 5, 7), dtype=jnp.float32)  # total = 105
    out2 = jax.block_until_ready(flatten_layer(x2))
    assert bool(jnp.array_equal(out2, jnp.reshape(x2, (3, -1)))), "padded path mismatch"

    print("KERNEL_OK")
</pallas_src>

<mosaic_0001>
module attributes {stable_mosaic.version = 11 : i64} {
  func.func @_copy_kernel(%arg0: i32, %arg1: memref<1x2048xf32, #tpu.memory_space<vmem>>, %arg2: memref<1x2048xf32, #tpu.memory_space<vmem>>) attributes {dimension_semantics = [#tpu.dimension_semantics<parallel>], iteration_bounds = array<i64: 1>, scalar_prefetch = 0 : i64, scratch_operands = 0 : i64, tpu.core_type = #tpu.core_type<tc>, window_params = [{transform_indices = @transform_0, window_bounds = array<i64: 1, 2048>}, {transform_indices = @transform_1, window_bounds = array<i64: 1, 2048>}]} {
    %c0 = arith.constant 0 : index
    %c0_0 = arith.constant 0 : index
    %0 = vector.load %arg1[%c0, %c0_0] : memref<1x2048xf32, #tpu.memory_space<vmem>>, vector<1x2048xf32>
    %c0_1 = arith.constant 0 : index
    %c0_2 = arith.constant 0 : index
    %1 = vector.load %arg2[%c0_1, %c0_2] : memref<1x2048xf32, #tpu.memory_space<vmem>>, vector<1x2048xf32>
    tpu.vector_store %arg2[%c0_1, %c0_2], %0 {strides = array<i32>} : memref<1x2048xf32, #tpu.memory_space<vmem>>, vector<1x2048xf32>,
    return
  }
  func.func @transform_0(%arg0: i32) -> (i32, i32) {
    %c0_i32 = arith.constant 0 : i32
    %c0_i32_0 = arith.constant 0 : i32
    return %arg0, %c0_i32 : i32, i32
  }
  func.func @transform_1(%arg0: i32) -> (i32, i32) {
    %c0_i32 = arith.constant 0 : i32
    %c0_i32_0 = arith.constant 0 : i32
    return %arg0, %c0_i32 : i32, i32
  }
}

</mosaic_0001>

<bundles_post_ra>
// kernel: tpu_custom_call.1
= control target key start
LH: loop header
LB: loop body
LE: loop exit
PB: predicated region body
PF: predicated region fallthrough
CT: control target
= control target key end

     0   :  { %6 = vsyncpa [#allocation3], 0  ;;  %s104_s0 = inlined_call_operand.hbm [shape: f32[1,2048], index: 0, kind: input, shape index: {}]   ;;  %s105_s1 = inlined_call_operand.hbm [shape: f32[1,2048], index: 1, kind: output, shape index: {}]  }
   0x1   :  { %7 = vsyncpa [#allocation4], 0  ;;  %s86_s6 = smov [#allocation2]  }
   0x2   :  { %s14_s7 = sshll.u32 %s86_s6, 4  ;;  %s15_s7 = int_to_ptr.vmem [resolvable:$true] %s14_s7 }
   0x3   :  { %s50_s8 = scalar_lea.vmem %s15_s7, 256  ;;  %p55_p1 = scmp.lt.s32.totalorder %s15_s7, %s15_s7 }
   0x4   :  { %p51_p0 = scmp.ne.s32.totalorder %s15_s7, %s50_s8  ;;  %p56_p2 = scmp.lt.s32.totalorder %s50_s8, %s50_s8 }
   0x6   :  { %p57_p3 = por %p56_p2, %p55_p1 }
   0x8   :  { %p58_p4 = pnand %p57_p3, %p51_p0 }
   0xa   :  { %61 = shalt.err (!%p58_p4)
}
   0xb   :  { %17 = dma.hbm_to_vmem [thread:$0]  %s104_s0, 256, %s15_s7, [#allocation3]  }
   0xc   :  { %82 = dma.done.wait [#allocation3], 256  }
   0xd   :  { %83 = vsyncadd [#allocation3], 4294967040  ;;  %s87_s11 = smov [#allocation5]   ;;  %v21_v0 = vld [vmem:[#allocation2] sm:$0xff]  ;;  %v22_v1 = vld [vmem:[#allocation2 + $0x8] sm:$0xff] }
   0xe   :  { %s31_s12 = sshll.u32 %s87_s11, 4  ;;  %23 = vst [vmem:[#allocation5] sm:$0xff] %v21_v0  ;;  %24 = vst [vmem:[#allocation5 + $0x8] sm:$0xff] %v22_v1  ;;  %s32_s12 = int_to_ptr.vmem [resolvable:$true] %s31_s12 }
   0xf   :  { %s62_s13 = scalar_lea.vmem %s32_s12, 256  ;;  %p67_p6 = scmp.lt.s32.totalorder %s32_s12, %s32_s12 }
  0x10   :  { %p63_p5 = scmp.ne.s32.totalorder %s32_s12, %s62_s13  ;;  %p68_p7 = scmp.lt.s32.totalorder %s62_s13, %s62_s13 }
  0x12   :  { %p69_p8 = por %p68_p7, %p67_p6 }
  0x14   :  { %p70_p9 = pnand %p69_p8, %p63_p5 }
  0x16   :  { %73 = shalt.err (!%p70_p9)
}
  0x17   :  { %34 = dma.vmem_to_hbm [thread:$0]  %s32_s12, 256, %s105_s1, [#allocation4]  }
  0x18   :  { %84 = dma.done.wait [#allocation4], 256  }
  0x19   :  { %85 = vsyncadd [#allocation4], 4294967040 }
  0x1a   :  { %38 = vsyncpa [#allocation3], 1 }
  0x1b   :  { %39 = vsyncpa [#allocation4], 1 }

</bundles_post_ra>
